<compile_context>
chip_gen: v7x
topology: tpu7x:2x2x1
jax: 0.10.0
libtpu: 0.0.40
codegen_flags: <defaults>
</compile_context>

<pallas_src>
import jax
import jax.numpy as jnp
from jax.experimental import pallas as pl
from jax.experimental.pallas import tpu as pltpu

IN_DIM = 28 * 28   # 784
HID_DIM = 256
OUT_DIM = 10
OUT_PAD = 128      # lane-dense padded output width (multiple of 128)


def _round_up(n, m):
    return (n + m - 1) // m * m


def mlp_kernel(x_ref, w1_ref, b1_ref, w2_ref, b2_ref, o_ref):
    # x tile: (TB, 784) bf16
    x = x_ref[...]
    # First matmul on the MXU, f32 accumulation.
    h = jnp.dot(x, w1_ref[...], preferred_element_type=jnp.float32)   # (TB, 256)
    h = jnp.maximum(h + b1_ref[...], 0.0)                             # bias + ReLU (VPU)
    # Second matmul: cast activations to bf16, accumulate f32, lane-dense N=128.
    y = jnp.dot(h.astype(jnp.bfloat16), w2_ref[...],
                preferred_element_type=jnp.float32)                   # (TB, 128)
    o_ref[...] = (y + b2_ref[...]).astype(o_ref.dtype)


def simple_nn_forward(x, w1, b1, w2, b2, *, tb=512):
    """x: (B, 784) f32; w1: (784, 256); b1: (256,); w2: (256, 10); b2: (10,)."""
    B = x.shape[0]

    # Batch tile: multiple of 8 (sublane), capped at `tb`.
    TB = min(tb, _round_up(B, 8))
    padded_B = _round_up(B, TB)

    # bf16 inputs, f32 accumulation (review item 2).
    x_b = x.astype(jnp.bfloat16)
    if padded_B != B:
        x_b = jnp.pad(x_b, ((0, padded_B - B), (0, 0)))
    w1_b = w1.astype(jnp.bfloat16)

    # Lane-dense second matmul / output (review item 3): pad N from 10 -> 128.
    w2_p = jnp.pad(w2, ((0, 0), (0, OUT_PAD - OUT_DIM))).astype(jnp.bfloat16)
    b2_p = jnp.pad(b2, (0, OUT_PAD - OUT_DIM)).reshape(1, OUT_PAD).astype(jnp.float32)
    b1_2d = b1.reshape(1, HID_DIM).astype(jnp.float32)

    grid = (padded_B // TB,)

    cost = pl.CostEstimate(
        flops=2 * padded_B * (IN_DIM * HID_DIM + HID_DIM * OUT_PAD),
        transcendentals=0,
        bytes_accessed=(x_b.size * 2 + w1_b.size * 2 + w2_p.size * 2
                        + b1_2d.size * 4 + b2_p.size * 4
                        + padded_B * OUT_PAD * 4),
    )

    out_padded = pl.pallas_call(
        mlp_kernel,
        out_shape=jax.ShapeDtypeStruct((padded_B, OUT_PAD), jnp.float32),
        grid=grid,
        in_specs=[
            pl.BlockSpec((TB, IN_DIM), lambda i: (i, 0)),        # x tile streams
            pl.BlockSpec((IN_DIM, HID_DIM), lambda i: (0, 0)),   # weights resident
            pl.BlockSpec((1, HID_DIM), lambda i: (0, 0)),
            pl.BlockSpec((HID_DIM, OUT_PAD), lambda i: (0, 0)),
            pl.BlockSpec((1, OUT_PAD), lambda i: (0, 0)),
        ],
        out_specs=pl.BlockSpec((TB, OUT_PAD), lambda i: (i, 0)),
        compiler_params=pltpu.CompilerParams(
            dimension_semantics=("parallel",),
        ),
        cost_estimate=cost,
    )(x_b, w1_b, b1_2d, w2_p, b2_p)

    # Slice padded batch rows and padded output lanes back to (B, 10).
    return out_padded[:B, :OUT_DIM]


def init_params(key):
    # Deterministic, PyTorch-Linear-style init: U(-1/sqrt(fan_in), 1/sqrt(fan_in)).
    k1, k2, k3, k4 = jax.random.split(key, 4)
    lim1 = 1.0 / jnp.sqrt(jnp.float32(IN_DIM))
    lim2 = 1.0 / jnp.sqrt(jnp.float32(HID_DIM))
    w1 = jax.random.uniform(k1, (IN_DIM, HID_DIM), jnp.float32, -lim1, lim1)
    b1 = jax.random.uniform(k2, (HID_DIM,), jnp.float32, -lim1, lim1)
    w2 = jax.random.uniform(k3, (HID_DIM, OUT_DIM), jnp.float32, -lim2, lim2)
    b2 = jax.random.uniform(k4, (OUT_DIM,), jnp.float32, -lim2, lim2)
    return w1, b1, w2, b2


if __name__ == "__main__":
    key = jax.random.PRNGKey(0)
    kx, kp = jax.random.split(key)

    B = 2
    x = jax.random.normal(kx, (B, IN_DIM), jnp.float32)
    w1, b1, w2, b2 = init_params(kp)

    out = simple_nn_forward(x, w1, b1, w2, b2)
    out = jax.block_until_ready(out)
    assert out.shape == (B, OUT_DIM)

    # Reference 1: same bf16-input / f32-accumulate math in plain JAX (tight check).
    xb = x.astype(jnp.bfloat16)
    h_ref = jnp.maximum(
        jnp.dot(xb, w1.astype(jnp.bfloat16), preferred_element_type=jnp.float32) + b1,
        0.0)
    ref_bf16 = jnp.dot(h_ref.astype(jnp.bfloat16), w2.astype(jnp.bfloat16),
                       preferred_element_type=jnp.float32) + b2
    assert jnp.allclose(out, ref_bf16, atol=1e-3, rtol=1e-3), "mismatch vs bf16 reference"

    # Reference 2: pure f32 forward (loose check — bf16 inputs lose ~3 decimal digits).
    ref_f32 = jnp.maximum(x @ w1 + b1, 0.0) @ w2 + b2
    assert jnp.allclose(out, ref_f32, atol=5e-2, rtol=5e-2), "mismatch vs f32 reference"

    print("KERNEL_OK")
</pallas_src>

<mosaic_0001>
module attributes {stable_mosaic.version = 11 : i64} {
  func.func @mlp_kernel(%arg0: i32, %arg1: memref<8x784xbf16, #tpu.memory_space<vmem>>, %arg2: memref<784x256xbf16, #tpu.memory_space<vmem>>, %arg3: memref<1x256xf32, #tpu.memory_space<vmem>>, %arg4: memref<256x128xbf16, #tpu.memory_space<vmem>>, %arg5: memref<1x128xf32, #tpu.memory_space<vmem>>, %arg6: memref<8x128xf32, #tpu.memory_space<vmem>>) attributes {dimension_semantics = [#tpu.dimension_semantics<parallel>], iteration_bounds = array<i64: 1>, scalar_prefetch = 0 : i64, scratch_operands = 0 : i64, tpu.core_type = #tpu.core_type<tc>, window_params = [{transform_indices = @transform_0, window_bounds = array<i64: 8, 784>}, {pipeline_mode = #tpu.pipeline_mode<synchronous>, transform_indices = @transform_1, window_bounds = array<i64: 784, 256>}, {pipeline_mode = #tpu.pipeline_mode<synchronous>, transform_indices = @transform_2, window_bounds = array<i64: 1, 256>}, {pipeline_mode = #tpu.pipeline_mode<synchronous>, transform_indices = @transform_3, window_bounds = array<i64: 256, 128>}, {pipeline_mode = #tpu.pipeline_mode<synchronous>, transform_indices = @transform_4, window_bounds = array<i64: 1, 128>}, {transform_indices = @transform_5, window_bounds = array<i64: 8, 128>}]} {
    %c0 = arith.constant 0 : index
    %c0_0 = arith.constant 0 : index
    %0 = vector.load %arg1[%c0, %c0_0] : memref<8x784xbf16, #tpu.memory_space<vmem>>, vector<8x784xbf16>
    %c0_1 = arith.constant 0 : index
    %c0_2 = arith.constant 0 : index
    %1 = vector.load %arg2[%c0_1, %c0_2] : memref<784x256xbf16, #tpu.memory_space<vmem>>, vector<784x256xbf16>
    %cst = arith.constant dense<0.000000e+00> : vector<8x256xf32>
    %2 = tpu.matmul %0, %1, %cst {dimension_numbers = #tpu.dot_dimension_numbers<[1], [0], [0], [1], [0, 0, 1, 1], [], []>} : vector<8x784xbf16>, vector<784x256xbf16>, vector<8x256xf32> -> vector<8x256xf32>
    %c0_3 = arith.constant 0 : index
    %c0_4 = arith.constant 0 : index
    %3 = vector.load %arg3[%c0_3, %c0_4] : memref<1x256xf32, #tpu.memory_space<vmem>>, vector<1x256xf32>
    %4 = vector.broadcast %3 : vector<1x256xf32> to vector<8x256xf32>
    %5 = arith.addf %2, %4 : vector<8x256xf32>
    %cst_5 = arith.constant 0.000000e+00 : f32
    %6 = vector.broadcast %cst_5 : f32 to vector<8x256xf32>
    %7 = arith.maximumf %5, %6 : vector<8x256xf32>
    %8 = arith.truncf %7 : vector<8x256xf32> to vector<8x256xbf16>
    %c0_6 = arith.constant 0 : index
    %c0_7 = arith.constant 0 : index
    %9 = vector.load %arg4[%c0_6, %c0_7] : memref<256x128xbf16, #tpu.memory_space<vmem>>, vector<256x128xbf16>
    %cst_8 = arith.constant dense<0.000000e+00> : vector<8x128xf32>
    %10 = tpu.matmul %8, %9, %cst_8 {dimension_numbers = #tpu.dot_dimension_numbers<[1], [0], [0], [1], [0, 0, 1, 1], [], []>} : vector<8x256xbf16>, vector<256x128xbf16>, vector<8x128xf32> -> vector<8x128xf32>
    %c0_9 = arith.constant 0 : index
    %c0_10 = arith.constant 0 : index
    %11 = vector.load %arg5[%c0_9, %c0_10] : memref<1x128xf32, #tpu.memory_space<vmem>>, vector<1x128xf32>
    %12 = vector.broadcast %11 : vector<1x128xf32> to vector<8x128xf32>
    %13 = arith.addf %10, %12 : vector<8x128xf32>
    %c0_11 = arith.constant 0 : index
    %c0_12 = arith.constant 0 : index
    %14 = vector.load %arg6[%c0_11, %c0_12] : memref<8x128xf32, #tpu.memory_space<vmem>>, vector<8x128xf32>
    tpu.vector_store %arg6[%c0_11, %c0_12], %13 {strides = array<i32>} : memref<8x128xf32, #tpu.memory_space<vmem>>, vector<8x128xf32>,
    return
  }
  func.func @transform_0(%arg0: i32) -> (i32, i32) {
    %c0_i32 = arith.constant 0 : i32
    %c0_i32_0 = arith.constant 0 : i32
    return %arg0, %c0_i32 : i32, i32
  }
  func.func @transform_1(%arg0: i32) -> (i32, i32) {
    %c0_i32 = arith.constant 0 : i32
    %c0_i32_0 = arith.constant 0 : i32
    %c0_i32_1 = arith.constant 0 : i32
    return %c0_i32, %c0_i32_0 : i32, i32
  }
  func.func @transform_2(%arg0: i32) -> (i32, i32) {
    %c0_i32 = arith.constant 0 : i32
    %c0_i32_0 = arith.constant 0 : i32
    %c0_i32_1 = arith.constant 0 : i32
    return %c0_i32, %c0_i32_0 : i32, i32
  }
  func.func @transform_3(%arg0: i32) -> (i32, i32) {
    %c0_i32 = arith.constant 0 : i32
    %c0_i32_0 = arith.constant 0 : i32
    %c0_i32_1 = arith.constant 0 : i32
    return %c0_i32, %c0_i32_0 : i32, i32
  }
  func.func @transform_4(%arg0: i32) -> (i32, i32) {
    %c0_i32 = arith.constant 0 : i32
    %c0_i32_0 = arith.constant 0 : i32
    %c0_i32_1 = arith.constant 0 : i32
    return %c0_i32, %c0_i32_0 : i32, i32
  }
  func.func @transform_5(%arg0: i32) -> (i32, i32) {
    %c0_i32 = arith.constant 0 : i32
    %c0_i32_0 = arith.constant 0 : i32
    return %arg0, %c0_i32 : i32, i32
  }
}

</mosaic_0001>

<bundles_post_ra>
// kernel: tpu_custom_call.1
= control target key start
LH: loop header
LB: loop body
LE: loop exit
PB: predicated region body
PF: predicated region fallthrough
CT: control target
= control target key end

     0   :  { %10 = vsyncpa [#allocation3], 0  ;;  %s1586_s0 = inlined_call_operand.hbm [shape: bf16[8,784], index: 0, kind: input, shape index: {}]   ;;  %s1587_s1 = inlined_call_operand.hbm [shape: bf16[784,256], index: 1, kind: input, shape index: {}]   ;;  %s1588_s2 = inlined_call_operand.vmem [shape: f32[1,256], index: 2, kind: input, shape index: {}]   ;;  %s1589_s3 = inlined_call_operand.hbm [shape: bf16[256,128], index: 3, kind: input, shape index: {}]   ;;  %s1590_s4 = inlined_call_operand.vmem [shape: f32[1,128], index: 4, kind: input, shape index: {}]   ;;  %s1591_s5 = inlined_call_operand.hbm [shape: f32[8,128], index: 5, kind: output, shape index: {}]  }
   0x1   :  { %11 = vsyncpa [#allocation6], 0 }
   0x2   :  { %12 = vsyncpa [#allocation4], 0  ;;  %s1481_s18 = smov [#allocation5]   ;;  %s1387_s22 = scalar_lea.hbm %s1587_s1, 12544 }
   0x3   :  { %s28_s19 = sshll.u32 %s1481_s18, 4  ;;  %p1388_p0 = scmp.ne.s32.totalorder %s1587_s1, %s1387_s22  ;;  %s29_s19 = int_to_ptr.vmem [resolvable:$true] %s28_s19 }
   0x4   :  { %p1391_p1 = scmp.lt.u32.totalorder %s1387_s22, %s1587_s1 }
   0x6   :  { %p1393_p2 = pnand %p1391_p1, %p1388_p0 }
   0x8   :  { %1396 = shalt.err (!%p1393_p2)
}
   0x9   :  { %s1397_s27 = scalar_lea.vmem %s29_s19, 12544  ;;  %p1402_p4 = scmp.lt.s32.totalorder %s29_s19, %s29_s19 }
   0xa   :  { %p1398_p3 = scmp.ne.s32.totalorder %s29_s19, %s1397_s27  ;;  %p1403_p5 = scmp.lt.s32.totalorder %s1397_s27, %s1397_s27 }
   0xc   :  { %p1404_p6 = por %p1403_p5, %p1402_p4 }
   0xe   :  { %p1405_p7 = pnand %p1404_p6, %p1398_p3 }
  0x10   :  { %1408 = shalt.err (!%p1405_p7)
}
  0x11   :  { %s1482_s28 = smov 128   ;;  %s1483_s29 = smov 8  }
  0x12   :  { %34 = dma.hbm_to_vmem [thread:$0]  %s1587_s1, 12544, %s29_s19, [#allocation6], %s1482_s28, %s1482_s28, %s1483_s29  }
  0x13   :  { %s1484_s7 = smov [#allocation2]   ;;  %s1485_s9 = smov [#allocation7]  }
  0x14   :  { %s19_s8 = sshll.u32 %s1484_s7, 4  ;;  %s42_s10 = sshll.u32 %s1485_s9, 4  ;;  %s20_s8 = int_to_ptr.vmem [resolvable:$true] %s19_s8  ;;  %s43_s10 = int_to_ptr.vmem [resolvable:$true] %s42_s10 }
  0x15   :  { %s1409_s13 = scalar_lea.hbm %s1586_s0, 448 }
  0x16   :  { %p1410_p8 = scmp.ne.s32.totalorder %s1586_s0, %s1409_s13  ;;  %p1413_p9 = scmp.lt.u32.totalorder %s1409_s13, %s1586_s0 }
  0x18   :  { %p1415_p10 = pnand %p1413_p9, %p1410_p8 }
  0x1a   :  { %1418 = shalt.err (!%p1415_p10)
}
  0x1b   :  { %s1419_s1 = scalar_lea.vmem %s20_s8, 448  ;;  %p1424_p12 = scmp.lt.s32.totalorder %s20_s8, %s20_s8 }
  0x1c   :  { %p1420_p11 = scmp.ne.s32.totalorder %s20_s8, %s1419_s1  ;;  %p1425_p13 = scmp.lt.s32.totalorder %s1419_s1, %s1419_s1 }
  0x1e   :  { %p1426_p0 = por %p1425_p13, %p1424_p12 }
  0x20   :  { %p1427_p1 = pnand %p1426_p0, %p1420_p11 }
  0x22   :  { %1430 = shalt.err (!%p1427_p1)
}
  0x23   :  { %22 = dma.hbm_to_vmem [thread:$0]  %s1586_s0, 448, %s20_s8, [#allocation3]  }
  0x24   :  { %s1431_s22 = scalar_lea.hbm %s1589_s3, 2048 }
  0x25   :  { %p1432_p2 = scmp.ne.s32.totalorder %s1589_s3, %s1431_s22  ;;  %p1435_p3 = scmp.lt.u32.totalorder %s1431_s22, %s1589_s3 }
  0x27   :  { %p1437_p4 = pnand %p1435_p3, %p1432_p2 }
  0x29   :  { %1440 = shalt.err (!%p1437_p4)
}
  0x2a   :  { %s1441_s27 = scalar_lea.vmem %s43_s10, 2048  ;;  %p1446_p6 = scmp.lt.s32.totalorder %s43_s10, %s43_s10 }
  0x2b   :  { %p1442_p5 = scmp.ne.s32.totalorder %s43_s10, %s1441_s27  ;;  %p1447_p7 = scmp.lt.s32.totalorder %s1441_s27, %s1441_s27 }
  0x2d   :  { %p1448_p8 = por %p1447_p7, %p1446_p6 }
  0x2f   :  { %p1449_p9 = pnand %p1448_p8, %p1442_p5 }
  0x31   :  { %1452 = shalt.err (!%p1449_p9)
}
  0x32   :  { %s1486_s0 = smov 64   ;;  %s1487_s28 = smov 4  }
  0x33   :  { %48 = dma.hbm_to_vmem [thread:$0]  %s1589_s3, 2048, %s43_s10, [#allocation6], %s1486_s0, %s1486_s0, %s1487_s28  }
  0x34   :  { %1475 = dma.done.wait [#allocation3], 448  }
  0x35   :  { %1476 = vsyncadd [#allocation3], 4294966848 }
  0x36   :  { %1477 = dma.done.wait [#allocation6], 14592  }
  0x37   :  { %1478 = vsyncadd [#allocation6], 4294952704  ;;  %v1217_v0 = vld [vmem:[#allocation5 + $0x104] ss:$8 sps:$4 sm:$0xff]   ;;  %v1219_v1 = vld [vmem:[#allocation5 + $0x100] ss:$8 sps:$4 sm:$0xff]  }
  0x38   :  { %734 = vmatprep.subr.bf16.mxu0 %v1217_v0  ;;  %v1220_v2 = vld [vmem:[#allocation5 + $0x114] ss:$8 sps:$4 sm:$0xff]   ;;  %v1222_v3 = vld [vmem:[#allocation5 + $0x110] ss:$8 sps:$4 sm:$0xff]   ;;  %v1223_v4 = vld [vmem:[#allocation5 + $0x124] ss:$8 sps:$4 sm:$0xff]  }
  0x39   :  { %735 = vmatpush1.bf16.msra.mxu0 %v1219_v1  ;;  %v1225_v5 = vld [vmem:[#allocation5 + $0x120] ss:$8 sps:$4 sm:$0xff]   ;;  %v1226_v6 = vld [vmem:[#allocation5 + $0x134] ss:$8 sps:$4 sm:$0xff]   ;;  %v1228_v7 = vld [vmem:[#allocation5 + $0x130] ss:$8 sps:$4 sm:$0xff]  }
  0x3a   :  { %736 = vmatprep.subr.bf16.mxu0 %v1220_v2  ;;  %v1229_v8 = vld [vmem:[#allocation5 + $0x144] ss:$8 sps:$4 sm:$0xff]   ;;  %v1231_v9 = vld [vmem:[#allocation5 + $0x140] ss:$8 sps:$4 sm:$0xff]   ;;  %v1232_v10 = vld [vmem:[#allocation5 + $0x154] ss:$8 sps:$4 sm:$0xff]  }
  0x3b   :  { %v1234_v11 = vld [vmem:[#allocation5 + $0x150] ss:$8 sps:$4 sm:$0xff]   ;;  %v1259_v12 = vld [vmem:[#allocation5 + $0x4] ss:$8 sps:$4 sm:$0xff]   ;;  %v1261_v13 = vld [vmem:[#allocation5] ss:$8 sps:$4 sm:$0xff]  }
  0x3c   :  { %v1235_v14 = vld [vmem:[#allocation5 + $0x164] ss:$8 sps:$4 sm:$0xff]   ;;  %693 = vmatprep.subr.bf16.mxu1 %v1259_v12  ;;  %v1265_v15 = vld [vmem:[#allocation5 + $0x14] ss:$8 sps:$4 sm:$0xff]   ;;  %v1267_v16 = vld [vmem:[#allocation5 + $0x10] ss:$8 sps:$4 sm:$0xff]  }
  0x3d   :  { %737 = vmatpush1.bf16.msra.mxu0 %v1222_v3  ;;  %694 = vmatpush1.bf16.msra.mxu1 %v1261_v13  ;;  %v1237_v17 = vld [vmem:[#allocation5 + $0x160] ss:$8 sps:$4 sm:$0xff]   ;;  %v1238_v18 = vld [vmem:[#allocation5 + $0x174] ss:$8 sps:$4 sm:$0xff]   ;;  %v1271_v19 = vld [vmem:[#allocation5 + $0x24] ss:$8 sps:$4 sm:$0xff]  }
  0x3e   :  { %738 = vmatprep.subr.bf16.mxu0 %v1223_v4  ;;  %695 = vmatprep.subr.bf16.mxu1 %v1265_v15  ;;  %v1556_v20 = vld [vmem:[#allocation2 + $0x8] sm:$0xff]  ;;  %v1273_v22 = vld [vmem:[#allocation5 + $0x20] ss:$8 sps:$4 sm:$0xff]   ;;  %v1279_v24 = vld [vmem:[#allocation5 + $0x34] ss:$8 sps:$4 sm:$0xff]   ;;  %vm689_vm0 = vcmask 130048  }
  0x3f   :  { %v1240_v21 = vld [vmem:[#allocation5 + $0x170] ss:$8 sps:$4 sm:$0xff]   ;;  %v1056_v23 = vcombine.high %v1556_v20, %v1556_v20  ;;  %v1241_v25 = vld [vmem:[#allocation5 + $0x184] ss:$8 sps:$4 sm:$0xff]   ;;  %v1243_v26 = vld [vmem:[#allocation5 + $0x180] ss:$8 sps:$4 sm:$0xff]   ;;  %v1055_v60 = vcombine.low %v1556_v20, %v1556_v20 }
  0x40   :  { %v1281_v27 = vld [vmem:[#allocation5 + $0x30] ss:$8 sps:$4 sm:$0xff]   ;;  %v1285_v28 = vld [vmem:[#allocation5 + $0x44] ss:$8 sps:$4 sm:$0xff]   ;;  %v1244_v29 = vld [vmem:[#allocation5 + $0x194] ss:$8 sps:$4 sm:$0xff]  }
  0x41   :  { %739 = vmatpush1.bf16.msra.mxu0 %v1225_v5  ;;  %696 = vmatpush1.bf16.msra.mxu1 %v1267_v16  ;;  %v1246_v30 = vld [vmem:[#allocation5 + $0x190] ss:$8 sps:$4 sm:$0xff]   ;;  %v1287_v31 = vld [vmem:[#allocation5 + $0x40] ss:$8 sps:$4 sm:$0xff]   ;;  %v1291_v32 = vld [vmem:[#allocation5 + $0x54] ss:$8 sps:$4 sm:$0xff]  }
  0x42   :  { %740 = vmatprep.subr.bf16.mxu0 %v1226_v6  ;;  %697 = vmatprep.subr.bf16.mxu1 %v1271_v19  ;;  %v1247_v33 = vld [vmem:[#allocation5 + $0x1a4] ss:$8 sps:$4 sm:$0xff]   ;;  %v1249_v34 = vld [vmem:[#allocation5 + $0x1a0] ss:$8 sps:$4 sm:$0xff]   ;;  %v1293_v35 = vld [vmem:[#allocation5 + $0x50] ss:$8 sps:$4 sm:$0xff]  }
  0x43   :  { %766 = vmatprep.mubr.bf16.mxu0 %v1056_v23  ;;  %v1297_v36 = vld [vmem:[#allocation5 + $0x64] ss:$8 sps:$4 sm:$0xff]   ;;  %v1250_v37 = vld [vmem:[#allocation5 + $0x1b4] ss:$8 sps:$4 sm:$0xff]   ;;  %v1252_v38 = vld [vmem:[#allocation5 + $0x1b0] ss:$8 sps:$4 sm:$0xff]  }
  0x44   :  { %v1299_v39 = vld [vmem:[#allocation5 + $0x60] ss:$8 sps:$4 sm:$0xff]   ;;  %v1303_v40 = vld [vmem:[#allocation5 + $0x74] ss:$8 sps:$4 sm:$0xff]   ;;  %v1253_v41 = vld [vmem:[#allocation5 + $0x1c4] ss:$8 sps:$4 sm:$0xff]  }
  0x45   :  { %741 = vmatpush1.bf16.msra.mxu0 %v1228_v7  ;;  %698 = vmatpush1.bf16.msra.mxu1 %v1273_v22  ;;  %v1255_v42 = vld [vmem:[#allocation5 + $0x1c0] ss:$8 sps:$4 sm:$0xff]   ;;  %v1305_v43 = vld [vmem:[#allocation5 + $0x70] ss:$8 sps:$4 sm:$0xff]   ;;  %v1309_v44 = vld [vmem:[#allocation5 + $0x84] ss:$8 sps:$4 sm:$0xff]  }
  0x46   :  { %742 = vmatprep.subr.bf16.mxu0 %v1229_v8  ;;  %699 = vmatprep.subr.bf16.mxu1 %v1279_v24  ;;  %v1256_v45 = vld [vmem:[#allocation5 + $0x1d4] ss:$8 sps:$4 sm:$0xff]   ;;  %v1258_v46 = vld [vmem:[#allocation5 + $0x1d0] ss:$8 sps:$4 sm:$0xff]   ;;  %v1311_v47 = vld [vmem:[#allocation5 + $0x80] ss:$8 sps:$4 sm:$0xff]  }
  0x47   :  { %v1315_v48 = vld [vmem:[#allocation5 + $0x94] ss:$8 sps:$4 sm:$0xff]   ;;  %v1262_v49 = vld [vmem:[#allocation5 + $0x1e4] ss:$8 sps:$4 sm:$0xff]   ;;  %v1264_v50 = vld [vmem:[#allocation5 + $0x1e0] ss:$8 sps:$4 sm:$0xff]  }
  0x48   :  { %v1317_v51 = vld [vmem:[#allocation5 + $0x90] ss:$8 sps:$4 sm:$0xff]   ;;  %v1321_v52 = vld [vmem:[#allocation5 + $0xa4] ss:$8 sps:$4 sm:$0xff]   ;;  %v1268_v53 = vld [vmem:[#allocation5 + $0x1f4] ss:$8 sps:$4 sm:$0xff]  }
  0x49   :  { %743 = vmatpush1.bf16.msra.mxu0 %v1231_v9  ;;  %700 = vmatpush1.bf16.msra.mxu1 %v1281_v27  ;;  %v1270_v54 = vld [vmem:[#allocation5 + $0x1f0] ss:$8 sps:$4 sm:$0xff]   ;;  %v1323_v55 = vld [vmem:[#allocation5 + $0xa0] ss:$8 sps:$4 sm:$0xff]   ;;  %v1327_v56 = vld [vmem:[#allocation5 + $0xb4] ss:$8 sps:$4 sm:$0xff]  }
  0x4a   :  { %744 = vmatprep.subr.bf16.mxu0 %v1232_v10  ;;  %701 = vmatprep.subr.bf16.mxu1 %v1285_v28  ;;  %v1278_v57 = vld [vmem:[#allocation5 + $0x204] ss:$8 sps:$4 sm:$0xff]   ;;  %v1276_v58 = vld [vmem:[#allocation5 + $0x200] ss:$8 sps:$4 sm:$0xff]   ;;  %v1329_v61 = vld [vmem:[#allocation5 + $0xb0] ss:$8 sps:$4 sm:$0xff]  }
  0x4b   :  { %v61_v59 = vld [vmem:[#allocation2] sm:$0xff]  ;;  %v1284_v0 = vld [vmem:[#allocation5 + $0x214] ss:$8 sps:$4 sm:$0xff]   ;;  %v1282_v1 = vld [vmem:[#allocation5 + $0x210] ss:$8 sps:$4 sm:$0xff]   ;;  %v1488_v24 = vmov 0  }
  0x4c   :  { %v1054_v62 = vcombine.high %v61_v59, %v61_v59  ;;  %v1333_v63 = vld [vmem:[#allocation5 + $0xc4] ss:$8 sps:$4 sm:$0xff]   ;;  %v1335_v2 = vld [vmem:[#allocation5 + $0xc0] ss:$8 sps:$4 sm:$0xff]   ;;  %v1562_v3 = vld [vmem:[#allocation2 + $0x10] sm:$0xff]  ;;  %v1053_v19 = vcombine.low %v61_v59, %v61_v59  ;;  %s1489_s8 = smov [#allocation8]  }
  0x4d   :  { %745 = vmatpush1.bf16.msra.mxu0 %v1234_v11  ;;  %702 = vmatpush1.bf16.msra.mxu1 %v1287_v31  ;;  %v1339_v4 = vld [vmem:[#allocation5 + $0xd4] ss:$8 sps:$4 sm:$0xff]   ;;  %v1058_v5 = vcombine.high %v1562_v3, %v1562_v3  ;;  %v1290_v6 = vld [vmem:[#allocation5 + $0x224] ss:$8 sps:$4 sm:$0xff]   ;;  %v1288_v7 = vld [vmem:[#allocation5 + $0x220] ss:$8 sps:$4 sm:$0xff]  }
  0x4e   :  { %746 = vmatprep.subr.bf16.mxu0 %v1235_v14  ;;  %703 = vmatprep.subr.bf16.mxu1 %v1291_v32  ;;  %v1296_v8 = vld [vmem:[#allocation5 + $0x234] ss:$8 sps:$4 sm:$0xff]   ;;  %v1341_v9 = vld [vmem:[#allocation5 + $0xd0] ss:$8 sps:$4 sm:$0xff]   ;;  %v1345_v10 = vld [vmem:[#allocation5 + $0xe4] ss:$8 sps:$4 sm:$0xff]  }
  0x4f   :  { %725 = vmatprep.mubr.bf16.mxu1 %v1054_v62  ;;  %v1347_v11 = vld [vmem:[#allocation5 + $0xe0] ss:$8 sps:$4 sm:$0xff]   ;;  %v1294_v12 = vld [vmem:[#allocation5 + $0x230] ss:$8 sps:$4 sm:$0xff]   ;;  %v1351_v13 = vld [vmem:[#allocation5 + $0xf4] ss:$8 sps:$4 sm:$0xff]  }
  0x50   :  { %v1302_v14 = vld [vmem:[#allocation5 + $0x244] ss:$8 sps:$4 sm:$0xff]   ;;  %v1353_v15 = vld [vmem:[#allocation5 + $0xf0] ss:$8 sps:$4 sm:$0xff]   ;;  %v1300_v16 = vld [vmem:[#allocation5 + $0x240] ss:$8 sps:$4 sm:$0xff]  }
  0x51   :  { %747 = vmatpush1.bf16.msra.mxu0 %v1237_v17  ;;  %704 = vmatpush1.bf16.msra.mxu1 %v1293_v35  ;;  %v1364_v17 = vld [vmem:[#allocation5 + $0x304] ss:$8 sps:$4 sm:$0xff]   ;;  %v1362_v20 = vld [vmem:[#allocation5 + $0x300] ss:$8 sps:$4 sm:$0xff]   ;;  %v1371_v22 = vld [vmem:[#allocation7 + $0x40] sm:$0xff]   ;;  %s1043_s9 = sshll.u32 %s1489_s8, 4  ;;  %s1044_s9 = int_to_ptr.vmem [resolvable:$true] %s1043_s9 }
  0x52   :  { %748 = vmatprep.subr.bf16.mxu0 %v1238_v18  ;;  %705 = vmatprep.subr.bf16.mxu1 %v1297_v36  ;;  %v1308_v18 = vld [vmem:[#allocation5 + $0x254] ss:$8 sps:$4 sm:$0xff]   ;;  %v1314_v23 = vld [vmem:[#allocation5 + $0x264] ss:$8 sps:$4 sm:$0xff]   ;;  %s1453_s10 = scalar_lea.vmem %s1044_s9, 128  ;;  %p1458_p11 = scmp.lt.s32.totalorder %s1044_s9, %s1044_s9 }
  0x53   :  { %v1370_v27 = vld [vmem:[#allocation2 + $0x18] ss:$0 sps:$4 sm:$0xff]   ;;  %v1372_v28 = vld [vmem:[#allocation7] sm:$0xff]   ;;  %v1326_v31 = vld [vmem:[#allocation5 + $0x284] ss:$8 sps:$4 sm:$0xff]   ;;  %p1454_p10 = scmp.ne.s32.totalorder %s1044_s9, %s1453_s10  ;;  %p1459_p12 = scmp.lt.s32.totalorder %s1453_s10, %s1453_s10 }
  0x54   :  { %v1374_v32 = vld [vmem:[#allocation7 + $0x8] sm:$0xff]   ;;  %v1376_v36 = vld [vmem:[#allocation7 + $0x10] sm:$0xff]   ;;  %v1385_v59 = vld [vmem:[#allocation7 + $0x78] sm:$0xff]  }
  0x55   :  { %749 = vmatpush1.bf16.msra.mxu0 %v1240_v21  ;;  %706 = vmatpush1.bf16.msra.mxu1 %v1299_v39  ;;  %v1306_v21 = vld [vmem:[#allocation5 + $0x250] ss:$8 sps:$4 sm:$0xff]   ;;  %v1332_v35 = vld [vmem:[#allocation5 + $0x294] ss:$8 sps:$4 sm:$0xff]   ;;  %v1336_v39 = vld [vmem:[#allocation5 + $0x2a0] ss:$8 sps:$4 sm:$0xff]   ;;  %p1460_p13 = por %p1459_p12, %p1458_p11 }
  0x56   :  { %750 = vmatprep.subr.bf16.mxu0 %v1241_v25  ;;  %707 = vmatprep.subr.bf16.mxu1 %v1303_v40  ;;  %v1312_v25 = vld [vmem:[#allocation5 + $0x260] ss:$8 sps:$4 sm:$0xff]   ;;  %v1344_v40 = vld [vmem:[#allocation5 + $0x2b4] ss:$8 sps:$4 sm:$0xff]  }
  0x57   :  { %p1461_p0 = pnand %p1460_p13, %p1454_p10 }
  0x59   :  { %751 = vmatpush1.bf16.msra.mxu0 %v1243_v26  ;;  %708 = vmatpush1.bf16.msra.mxu1 %v1305_v43  ;;  %v1320_v26 = vld [vmem:[#allocation5 + $0x274] ss:$8 sps:$4 sm:$0xff]   ;;  %v1348_v43 = vld [vmem:[#allocation5 + $0x2c0] ss:$8 sps:$4 sm:$0xff]  }
  0x5a   :  { %752 = vmatprep.subr.bf16.mxu0 %v1244_v29  ;;  %709 = vmatprep.subr.bf16.mxu1 %v1309_v44  ;;  %v1318_v29 = vld [vmem:[#allocation5 + $0x270] ss:$8 sps:$4 sm:$0xff]   ;;  %v1356_v44 = vld [vmem:[#allocation5 + $0x2d4] ss:$8 sps:$4 sm:$0xff]  }
  0x5d   :  { %753 = vmatpush1.bf16.msra.mxu0 %v1246_v30  ;;  %710 = vmatpush1.bf16.msra.mxu1 %v1311_v47  ;;  %v1373_v30 = vld [vmem:[#allocation7 + $0x48] sm:$0xff]   ;;  %v1359_v47 = vld [vmem:[#allocation5 + $0x2e0] ss:$8 sps:$4 sm:$0xff]  }
  0x5e   :  { %754 = vmatprep.subr.bf16.mxu0 %v1247_v33  ;;  %711 = vmatprep.subr.bf16.mxu1 %v1315_v48  ;;  %v1324_v33 = vld [vmem:[#allocation5 + $0x280] ss:$8 sps:$4 sm:$0xff]   ;;  %v1367_v48 = vld [vmem:[#allocation5 + $0x2f4] ss:$8 sps:$4 sm:$0xff]  }
  0x61   :  { %755 = vmatpush1.bf16.msra.mxu0 %v1249_v34  ;;  %712 = vmatpush1.bf16.msra.mxu1 %v1317_v51  ;;  %v1375_v34 = vld [vmem:[#allocation7 + $0x50] sm:$0xff]   ;;  %v1377_v51 = vld [vmem:[#allocation7 + $0x58] sm:$0xff]  }
  0x62   :  { %756 = vmatprep.subr.bf16.mxu0 %v1250_v37  ;;  %713 = vmatprep.subr.bf16.mxu1 %v1321_v52  ;;  %v1330_v37 = vld [vmem:[#allocation5 + $0x290] ss:$8 sps:$4 sm:$0xff]   ;;  %v1378_v52 = vld [vmem:[#allocation7 + $0x18] sm:$0xff]  }
  0x65   :  { %757 = vmatpush1.bf16.msra.mxu0 %v1252_v38  ;;  %714 = vmatpush1.bf16.msra.mxu1 %v1323_v55  ;;  %v1338_v38 = vld [vmem:[#allocation5 + $0x2a4] ss:$8 sps:$4 sm:$0xff]   ;;  %v1381_v55 = vld [vmem:[#allocation7 + $0x68] sm:$0xff]  }
  0x66   :  { %758 = vmatprep.subr.bf16.mxu0 %v1253_v41  ;;  %715 = vmatprep.subr.bf16.mxu1 %v1327_v56  ;;  %v1342_v41 = vld [vmem:[#allocation5 + $0x2b0] ss:$8 sps:$4 sm:$0xff]  }
  0x67   :  { %v1382_v56 = vld [vmem:[#allocation7 + $0x28] sm:$0xff]  }
  0x69   :  { %759 = vmatpush1.bf16.msra.mxu0 %v1255_v42  ;;  %716 = vmatpush1.bf16.msra.mxu1 %v1329_v61  ;;  %v1350_v42 = vld [vmem:[#allocation5 + $0x2c4] ss:$8 sps:$4 sm:$0xff]  }
  0x6a   :  { %760 = vmatprep.subr.bf16.mxu0 %v1256_v45  ;;  %717 = vmatprep.subr.bf16.mxu1 %v1333_v63  ;;  %v1354_v45 = vld [vmem:[#allocation5 + $0x2d0] ss:$8 sps:$4 sm:$0xff]  }
  0x6d   :  { %761 = vmatpush1.bf16.msra.mxu0 %v1258_v46  ;;  %718 = vmatpush1.bf16.msra.mxu1 %v1335_v2  ;;  %v1361_v46 = vld [vmem:[#allocation5 + $0x2e4] ss:$8 sps:$4 sm:$0xff]  }
  0x6e   :  { %762 = vmatprep.subr.bf16.mxu0 %v1262_v49  ;;  %719 = vmatprep.subr.bf16.mxu1 %v1339_v4  ;;  %v1365_v49 = vld [vmem:[#allocation5 + $0x2f0] ss:$8 sps:$4 sm:$0xff]  }
  0x71   :  { %763 = vmatpush1.bf16.msra.mxu0 %v1264_v50  ;;  %720 = vmatpush1.bf16.msra.mxu1 %v1341_v9  ;;  %v1057_v50 = vcombine.low %v1562_v3, %v1562_v3 }
  0x72   :  { %764 = vmatprep.subr.bf16.mxu0 %v1268_v53  ;;  %721 = vmatprep.subr.bf16.mxu1 %v1345_v10  ;;  %v1379_v53 = vld [vmem:[#allocation7 + $0x60] sm:$0xff]  }
  0x75   :  { %765 = vmatpush1.bf16.msra.mxu0 %v1270_v54  ;;  %722 = vmatpush1.bf16.msra.mxu1 %v1347_v11  ;;  %v1380_v54 = vld [vmem:[#allocation7 + $0x20] sm:$0xff]  }
  0x76   :  { %775 = vmatprep.subr.bf16.mxu0 %v1278_v57  ;;  %723 = vmatprep.subr.bf16.mxu1 %v1351_v13  ;;  %v1383_v57 = vld [vmem:[#allocation7 + $0x70] sm:$0xff]  }
  0x78   :  { %767 = vmatmul.mubr.bf16.vlgmr.msra.gmra.mrb[0].mxu0 %v1055_v60  ;;  %v1386_v60 = vld [vmem:[#allocation7 + $0x38] sm:$0xff]  }
  0x79   :  { %776 = vmatpush1.bf16.msra.mxu0 %v1276_v58  ;;  %807 = vmatprep.mubr.bf16.mxu0 %v1058_v5  ;;  %v1384_v58 = vld [vmem:[#allocation7 + $0x30] sm:$0xff]   ;;  %v165_v5 = vlaneseq }
  0x7a   :  { %777 = vmatprep.subr.bf16.mxu0 %v1284_v0  ;;  %724 = vmatpush1.bf16.msra.mxu1 %v1353_v15 }
  0x7b   :  { %816 = vmatprep.subr.bf16.mxu1 %v1364_v17 }
  0x7d   :  { %778 = vmatpush1.bf16.msra.mxu0 %v1282_v1  ;;  %726 = vmatmul.mubr.bf16.vlgmr.msra.gmra.mrb[0].mxu1 %v1053_v19 }
  0x7e   :  { %779 = vmatprep.subr.bf16.mxu0 %v1290_v6  ;;  %817 = vmatpush1.bf16.msra.mxu1 %v1362_v20  ;;  %v166_v6 = vshrl.u32 %v165_v5, 7 }
  0x7f   :  { %848 = vmatprep.mubr.bf16.mxu1 %v1488_v24  ;;  %1176 = vmatprep.subr.bf16.mxu1 %v1371_v22 }
  0x80   :  { %v171_v9 = vsub.s32 1, %v166_v6 }
  0x81   :  { %780 = vmatpush1.bf16.msra.mxu0 %v1288_v7  ;;  %v167_v7 = vsub.s32 0, %v166_v6 }
  0x82   :  { %781 = vmatprep.subr.bf16.mxu0 %v1296_v8  ;;  %v163_v8 = vld [vmem:[%s1588_s2] sm:$0x3] }
  0x83   :  { %v168_v10 = vrot.slane %v163_v8, %v167_v7  ;;  %v172_v11 = vrot.slane %v163_v8, %v171_v9 }
  0x85   :  { %782 = vmatpush1.bf16.msra.mxu0 %v1294_v12  ;;  %1158 = vmatmul.mubr.msk.bf16.vlgmr.msra.gmra.mrb[4].mxu1 %vm689_vm0, %v1370_v27  ;;  %v1159_v27 = vld [vmem:[%s1590_s4] ss:$0 sm:$0xff] }
  0x86   :  { %783 = vmatprep.subr.bf16.mxu0 %v1302_v14  ;;  %1177 = vmatpush3.bf16.msra.mxu1 %v1372_v28 }
  0x87   :  { %1178 = vmatprep.subr.bf16.mxu1 %v1373_v30 }
  0x89   :  { %784 = vmatpush1.bf16.msra.mxu0 %v1300_v16 }
  0x8a   :  { %785 = vmatprep.subr.bf16.mxu0 %v1308_v18  ;;  %1179 = vmatpush3.bf16.msra.mxu1 %v1374_v32 }
  0x8b   :  { %1180 = vmatprep.subr.bf16.mxu1 %v1375_v34 }
  0x8d   :  { %786 = vmatpush1.bf16.msra.mxu0 %v1306_v21 }
  0x8e   :  { %787 = vmatprep.subr.bf16.mxu0 %v1314_v23  ;;  %1181 = vmatpush3.bf16.msra.mxu1 %v1376_v36 }
  0x8f   :  { %1182 = vmatprep.subr.bf16.mxu1 %v1377_v51 }
  0x91   :  { %788 = vmatpush1.bf16.msra.mxu0 %v1312_v25 }
  0x92   :  { %789 = vmatprep.subr.bf16.mxu0 %v1320_v26  ;;  %1183 = vmatpush3.bf16.msra.mxu1 %v1378_v52 }
  0x93   :  { %1184 = vmatprep.subr.bf16.mxu1 %v1379_v53 }
  0x95   :  { %790 = vmatpush1.bf16.msra.mxu0 %v1318_v29 }
  0x96   :  { %791 = vmatprep.subr.bf16.mxu0 %v1326_v31  ;;  %1185 = vmatpush3.bf16.msra.mxu1 %v1380_v54 }
  0x97   :  { %1186 = vmatprep.subr.bf16.mxu1 %v1381_v55 }
  0x99   :  { %792 = vmatpush1.bf16.msra.mxu0 %v1324_v33 }
  0x9a   :  { %793 = vmatprep.subr.bf16.mxu0 %v1332_v35  ;;  %1187 = vmatpush3.bf16.msra.mxu1 %v1382_v56 }
  0x9b   :  { %1188 = vmatprep.subr.bf16.mxu1 %v1383_v57 }
  0x9d   :  { %794 = vmatpush1.bf16.msra.mxu0 %v1330_v37 }
  0x9e   :  { %795 = vmatprep.subr.bf16.mxu0 %v1338_v38  ;;  %1189 = vmatpush3.bf16.msra.mxu1 %v1384_v58 }
  0x9f   :  { %1190 = vmatprep.subr.bf16.mxu1 %v1385_v59 }
  0xa1   :  { %796 = vmatpush1.bf16.msra.mxu0 %v1336_v39 }
  0xa2   :  { %797 = vmatprep.subr.bf16.mxu0 %v1344_v40  ;;  %1191 = vmatpush3.bf16.msra.mxu1 %v1386_v60 }
  0xa5   :  { %798 = vmatpush1.bf16.msra.mxu0 %v1342_v41 }
  0xa6   :  { %799 = vmatprep.subr.bf16.mxu0 %v1350_v42 }
  0xa9   :  { %800 = vmatpush1.bf16.msra.mxu0 %v1348_v43 }
  0xaa   :  { %801 = vmatprep.subr.bf16.mxu0 %v1356_v44 }
  0xad   :  { %802 = vmatpush1.bf16.msra.mxu0 %v1354_v45 }
  0xae   :  { %803 = vmatprep.subr.bf16.mxu0 %v1361_v46 }
  0xb1   :  { %804 = vmatpush1.bf16.msra.mxu0 %v1359_v47 }
  0xb2   :  { %805 = vmatprep.subr.bf16.mxu0 %v1367_v48 }
  0xb5   :  { %806 = vmatpush1.bf16.msra.mxu0 %v1365_v49 }
  0xb8   :  { %808 = vmatmul.mubr.bf16.vlgmr.msra.gmra.mrb[0].mxu0 %v1057_v50 }
 0x150   :  { %v727_v61 = vpop.f32.mrb[0].mxu1 }
 0x151   :  { %v729_v62 = vpop.f32.mrb[1].mxu1  ;;  %v728_v12 = vadd.f32 %v727_v61, %v168_v10 }
 0x152   :  { %v731_v63 = vpop.f32.mrb[2].mxu1  ;;  %v730_v13 = vadd.f32 %v729_v62, %v172_v11 }
 0x153   :  { %v732_v0 = vpop.f32.mrb[3].mxu1 }
 0x158   :  { %v850_v1 = vpop.f32.mrb[4].mxu1 }
 0x159   :  { %v852_v2 = vpop.f32.mrb[5].mxu1 }
 0x15a   :  { %v854_v3 = vpop.f32.mrb[6].mxu1 }
 0x15b   :  { %v855_v4 = vpop.f32.mrb[7].mxu1 }
 0x18b   :  { %v809_v14 = vpop.f32.mrb[0].mxu0 }
 0x18c   :  { %v1199_v15 = vadd.f32 %v809_v14, %v728_v12  ;;  %v811_v16 = vpop.f32.mrb[1].mxu0 }
 0x18d   :  { %v1202_v17 = vadd.f32 %v811_v16, %v730_v13  ;;  %v813_v18 = vpop.f32.mrb[2].mxu0 }
 0x18e   :  { %v1200_v19 = vadd.f32 %v1199_v15, %v850_v1  ;;  %v814_v20 = vpop.f32.mrb[3].mxu0 }
 0x18f   :  { %v1203_v21 = vadd.f32 %v1202_v17, %v852_v2 }
 0x190   :  { %v857_v22 = vmax.f32 %v1200_v19, 0.0 }
 0x191   :  { %v858_v23 = vmax.f32 %v1203_v21, 0.0 }
 0x192   :  { %v859_v25 = vpack.c.bf16 %v857_v22, %v857_v22 }
 0x193   :  { %v860_v24 = vpack.c.bf16 %v858_v23, %v858_v23 }
 0x195   :  { %1028 = vmatprep.mubr.bf16.mxu1 %v860_v24 }
 0x196   :  { %1029 = vmatmul.mubr.bf16.vlgmr.msra.gmra.mrb[8].mxu1 %v859_v25 }
 0x269   :  { %v1192_v26 = vpop.f32.mrb[8].mxu1 }
 0x26a   :  { %v1193_v28 = vpop.f32.mrb[9].mxu1 }
 0x26b   :  { %v1194_v29 = vadd.f32 %v1193_v28, %v1192_v26  ;;  %v1195_v30 = vpop.f32.mrb[10].mxu1 }
 0x26c   :  { %v1196_v31 = vpop.f32.mrb[11].mxu1 }
 0x26d   :  { %v1031_v32 = vadd.f32 %v1194_v29, %v1159_v27 }
 0x26f   :  { %1036 = vst [vmem:[#allocation8] sm:$0xff] %v1031_v32 }
 0x270   :  { %1464 = shalt.err (!%p1461_p0)
}
 0x271   :  { %s1465_s4 = scalar_lea.hbm %s1591_s5, 128 }
 0x272   :  { %p1466_p1 = scmp.ne.s32.totalorder %s1591_s5, %s1465_s4  ;;  %p1469_p2 = scmp.lt.u32.totalorder %s1465_s4, %s1591_s5 }
 0x274   :  { %p1471_p3 = pnand %p1469_p2, %p1466_p1 }
 0x276   :  { %1474 = shalt.err (!%p1471_p3)
}
 0x277   :  { %1046 = dma.vmem_to_hbm [thread:$0]  %s1044_s9, 128, %s1591_s5, [#allocation4]  }
 0x278   :  { %1479 = dma.done.wait [#allocation4], 128  }
 0x279   :  { %1480 = vsyncadd [#allocation4], 4294967168 }
 0x27a   :  { %1050 = vsyncpa [#allocation3], 1 }
 0x27b   :  { %1051 = vsyncpa [#allocation6], 1 }
 0x27c   :  { %1052 = vsyncpa [#allocation4], 1 }

</bundles_post_ra>
